<compile_context>
chip_gen: v6e
topology: v6e:2x2x1
jax: 0.10.0
libtpu: 0.0.40
codegen_flags: <defaults>
</compile_context>

<pallas_src>
import functools
import math

import jax
import jax.numpy as jnp
from jax import lax
from jax.experimental import pallas as pl
from jax.experimental.pallas import tpu as pltpu

NUM_UNITS = 128        # hidden width fixed by the model (and by lane geometry here)
TB_TARGET = 4096       # target batch tile (amortizes ~0.35us/step grid overhead)
SPLIT_THRESHOLD = 2048 # above this batch, force >=2 grid blocks (v7x has 2 TCs)


def _round_up(x, m):
    return (x + m - 1) // m * m


def _mlp_diffusion_kernel(xt_ref, rhs1_ref, b1_ref, w2_ref, b2_ref,
                          w3_ref, b3_ref, w4_ref, b4_ref, out_ref, *, n_steps):
    nu = NUM_UNITS
    xt = xt_ref[...]                               # (TB, 3) f32: [x0, x1, t]
    tb = xt.shape[0]
    nsp = rhs1_ref.shape[0]                        # padded step count (mult of 128)

    x0 = xt[:, 0:1]                                # (TB, 1) f32
    x1 = xt[:, 1:2]
    t = xt[:, 2:3].astype(jnp.int32)               # (TB, 1) int32 (exact: t < 2^24)

    # Build the combined one-hot / x LHS entirely in registers (no HBM gather):
    #   lane == t          -> 1.0        (selects emb0/emb1/emb2 rows of the RHS)
    #   lane == n_steps    -> x0         (hits w1 row 0)
    #   lane == n_steps+1  -> x1         (hits w1 row 1)
    lane = lax.broadcasted_iota(jnp.int32, (tb, nsp), 1)
    lhs = jnp.where(lane == t, 1.0,
          jnp.where(lane == n_steps, x0,
          jnp.where(lane == n_steps + 1, x1, 0.0))).astype(jnp.bfloat16)

    # Fused gather + layer 1 on the MXU: (TB, nsp) @ (nsp, 384) -> f32.
    fused = jnp.dot(lhs, rhs1_ref[...], preferred_element_type=jnp.float32)
    e1 = fused[:, nu:2 * nu]                       # emb1[t]   (128-aligned views)
    e2 = fused[:, 2 * nu:3 * nu]                   # emb2[t]

    # Layer 1 epilogue: fused[:, :128] = x@w1 + emb0[t].
    h = jnp.maximum(fused[:, 0:nu] + b1_ref[...], 0.0).astype(jnp.bfloat16)

    # Layer 2: Linear(128,128) + emb + ReLU.
    h = jnp.dot(h, w2_ref[...], preferred_element_type=jnp.float32)
    h = jnp.maximum(h + b2_ref[...] + e1, 0.0).astype(jnp.bfloat16)

    # Layer 3: Linear(128,128) + emb + ReLU.
    h = jnp.dot(h, w3_ref[...], preferred_element_type=jnp.float32)
    h = jnp.maximum(h + b3_ref[...] + e2, 0.0).astype(jnp.bfloat16)

    # Output layer: Linear(128,2) (w4 zero-padded to 128 wide for the MXU),
    # but only the 2 real columns are stored to HBM.
    out = jnp.dot(h, w4_ref[...], preferred_element_type=jnp.float32)
    out_ref[...] = out[:, 0:2] + b4_ref[...]


@functools.partial(jax.jit, static_argnames=("n_steps",))
def mlp_diffusion_forward(kparams, x, t, *, n_steps):
    """x: (B, 2) f32, t: (B,) int -> (B, 2) f32."""
    B = x.shape[0]
    nsp = kparams["rhs1"].shape[0]

    t = jnp.clip(t.astype(jnp.int32), 0, n_steps - 1)

    # Pack x and t into one streamed, narrow input: (B, 3) f32.
    xt = jnp.concatenate(
        [x.astype(jnp.float32), t.astype(jnp.float32)[:, None]], axis=1)

    # Adaptive batch tiling: bound padding waste, keep >=2 blocks for v7x's
    # two TensorCores once the batch is large enough.
    n_blocks = max(1, -(-B // TB_TARGET))
    if n_blocks == 1 and B >= SPLIT_THRESHOLD:
        n_blocks = 2
    TB = _round_up(-(-B // n_blocks), 8)
    B_pad = n_blocks * TB
    if B_pad != B:
        xt = jnp.pad(xt, ((0, B_pad - B), (0, 0)))   # padded rows: x=0, t=0

    const = lambda i: (0, 0)  # weights / tables: fetched once, VMEM-resident

    out = pl.pallas_call(
        functools.partial(_mlp_diffusion_kernel, n_steps=n_steps),
        out_shape=jax.ShapeDtypeStruct((B_pad, 2), jnp.float32),
        grid=(n_blocks,),
        in_specs=[
            pl.BlockSpec((TB, 3), lambda i: (i, 0)),            # packed [x, t]
            pl.BlockSpec((nsp, 3 * NUM_UNITS), const),          # fused emb + w1 RHS
            pl.BlockSpec((1, NUM_UNITS), const),                # b1
            pl.BlockSpec((NUM_UNITS, NUM_UNITS), const),        # w2
            pl.BlockSpec((1, NUM_UNITS), const),                # b2
            pl.BlockSpec((NUM_UNITS, NUM_UNITS), const),        # w3
            pl.BlockSpec((1, NUM_UNITS), const),                # b3
            pl.BlockSpec((NUM_UNITS, NUM_UNITS), const),        # w4 (lane-padded)
            pl.BlockSpec((1, 2), const),                        # b4
        ],
        out_specs=pl.BlockSpec((TB, 2), lambda i: (i, 0)),      # narrow: only real cols
        compiler_params=pltpu.CompilerParams(
            dimension_semantics=("parallel",),
            vmem_limit_bytes=48 * 1024 * 1024,
        ),
    )(xt, kparams["rhs1"], kparams["b1"], kparams["w2"], kparams["b2"],
      kparams["w3"], kparams["b3"], kparams["w4p"], kparams["b4"])

    return out[:B]


def init_params(key, n_steps, num_units=NUM_UNITS):
    """PyTorch-module-like f32 parameters (w: (in, out), b: (out,))."""
    assert num_units == NUM_UNITS
    keys = jax.random.split(key, 9)

    def linear(kw, kb, fan_in, fan_out):
        bound = 1.0 / math.sqrt(fan_in)
        w = jax.random.uniform(kw, (fan_in, fan_out), jnp.float32, -bound, bound)
        b = jax.random.uniform(kb, (fan_out,), jnp.float32, -bound, bound)
        return w, b

    w1, b1 = linear(keys[0], keys[1], 2, num_units)
    w2, b2 = linear(keys[2], keys[3], num_units, num_units)
    w3, b3 = linear(keys[4], keys[5], num_units, num_units)
    w4, b4 = linear(keys[6], keys[7], num_units, 2)
    emb = jax.random.normal(keys[8], (3, n_steps, num_units), jnp.float32)
    return dict(w1=w1, b1=b1, w2=w2, b2=b2, w3=w3, b3=b3, w4=w4, b4=b4, emb=emb)


def pack_params(params):
    """Fold the 3 embedding tables + layer-1 weight into one MXU RHS; bf16 weights."""
    nu = NUM_UNITS
    n_steps = params["emb"].shape[1]
    nsp = _round_up(n_steps + 2, 128)

    rhs1 = jnp.zeros((nsp, 3 * nu), jnp.float32)
    rhs1 = rhs1.at[:n_steps, 0:nu].set(params["emb"][0])
    rhs1 = rhs1.at[:n_steps, nu:2 * nu].set(params["emb"][1])
    rhs1 = rhs1.at[:n_steps, 2 * nu:3 * nu].set(params["emb"][2])
    rhs1 = rhs1.at[n_steps:n_steps + 2, 0:nu].set(params["w1"])

    w4p = jnp.zeros((nu, nu), jnp.float32).at[:, :2].set(params["w4"])

    return dict(
        rhs1=rhs1.astype(jnp.bfloat16),
        b1=params["b1"].reshape(1, nu),
        w2=params["w2"].astype(jnp.bfloat16),
        b2=params["b2"].reshape(1, nu),
        w3=params["w3"].astype(jnp.bfloat16),
        b3=params["b3"].reshape(1, nu),
        w4p=w4p.astype(jnp.bfloat16),
        b4=params["b4"].reshape(1, 2),
    )


def reference_forward(params, x, t):
    """Pure-JAX reference mirroring the kernel's bf16 weight/activation casts."""
    n_steps = params["emb"].shape[1]
    t = jnp.clip(t.astype(jnp.int32), 0, n_steps - 1)
    emb = jnp.take(params["emb"], t, axis=1)                    # (3, B, 128) f32
    bf = lambda a: a.astype(jnp.bfloat16).astype(jnp.float32)

    h = bf(x) @ bf(params["w1"]) + params["b1"] + bf(emb[0])
    h = bf(jnp.maximum(h, 0.0))
    h = h @ bf(params["w2"]) + params["b2"] + bf(emb[1])
    h = bf(jnp.maximum(h, 0.0))
    h = h @ bf(params["w3"]) + params["b3"] + bf(emb[2])
    h = bf(jnp.maximum(h, 0.0))
    out = h @ bf(params["w4"]) + params["b4"]
    return out


if __name__ == "__main__":
    key = jax.random.PRNGKey(0)
    kp, kx, kt = jax.random.split(key, 3)

    n_steps = 100
    B = 16  # small test batch (wrapper auto-picks the batch tile)

    params = init_params(kp, n_steps)
    kparams = pack_params(params)

    x = jax.random.normal(kx, (B, 2), dtype=jnp.float32)
    t = jax.random.randint(kt, (B,), 0, n_steps, dtype=jnp.int32)

    out = jax.block_until_ready(mlp_diffusion_forward(kparams, x, t, n_steps=n_steps))
    ref = jax.block_until_ready(reference_forward(params, x, t))

    assert out.shape == (B, 2), out.shape
    assert jnp.allclose(out, ref, rtol=5e-2, atol=5e-2), (
        f"max abs err {float(jnp.max(jnp.abs(out - ref)))}")

    print("KERNEL_OK")
</pallas_src>

<mosaic_0001>
module attributes {stable_mosaic.version = 11 : i64} {
  func.func @_mlp_diffusion_kernel(%arg0: i32, %arg1: memref<16x3xf32, #tpu.memory_space<vmem>>, %arg2: memref<128x384xbf16, #tpu.memory_space<vmem>>, %arg3: memref<1x128xf32, #tpu.memory_space<vmem>>, %arg4: memref<128x128xbf16, #tpu.memory_space<vmem>>, %arg5: memref<1x128xf32, #tpu.memory_space<vmem>>, %arg6: memref<128x128xbf16, #tpu.memory_space<vmem>>, %arg7: memref<1x128xf32, #tpu.memory_space<vmem>>, %arg8: memref<128x128xbf16, #tpu.memory_space<vmem>>, %arg9: memref<1x2xf32, #tpu.memory_space<vmem>>, %arg10: memref<16x2xf32, #tpu.memory_space<vmem>>) attributes {dimension_semantics = [#tpu.dimension_semantics<parallel>], iteration_bounds = array<i64: 1>, scalar_prefetch = 0 : i64, scratch_operands = 0 : i64, tpu.core_type = #tpu.core_type<tc>, window_params = [{transform_indices = @transform_0, window_bounds = array<i64: 16, 3>}, {pipeline_mode = #tpu.pipeline_mode<synchronous>, transform_indices = @transform_1, window_bounds = array<i64: 128, 384>}, {pipeline_mode = #tpu.pipeline_mode<synchronous>, transform_indices = @transform_2, window_bounds = array<i64: 1, 128>}, {pipeline_mode = #tpu.pipeline_mode<synchronous>, transform_indices = @transform_3, window_bounds = array<i64: 128, 128>}, {pipeline_mode = #tpu.pipeline_mode<synchronous>, transform_indices = @transform_4, window_bounds = array<i64: 1, 128>}, {pipeline_mode = #tpu.pipeline_mode<synchronous>, transform_indices = @transform_5, window_bounds = array<i64: 128, 128>}, {pipeline_mode = #tpu.pipeline_mode<synchronous>, transform_indices = @transform_6, window_bounds = array<i64: 1, 128>}, {pipeline_mode = #tpu.pipeline_mode<synchronous>, transform_indices = @transform_7, window_bounds = array<i64: 128, 128>}, {pipeline_mode = #tpu.pipeline_mode<synchronous>, transform_indices = @transform_8, window_bounds = array<i64: 1, 2>}, {transform_indices = @transform_9, window_bounds = array<i64: 16, 2>}]} {
    %c0 = arith.constant 0 : index
    %c0_0 = arith.constant 0 : index
    %0 = vector.load %arg1[%c0, %c0_0] : memref<16x3xf32, #tpu.memory_space<vmem>>, vector<16x3xf32>
    %1 = vector.extract_strided_slice %0 {offsets = [0, 0], sizes = [16, 1], strides = [1, 1]} : vector<16x3xf32> to vector<16x1xf32>
    %2 = vector.extract_strided_slice %0 {offsets = [0, 1], sizes = [16, 1], strides = [1, 1]} : vector<16x3xf32> to vector<16x1xf32>
    %3 = vector.extract_strided_slice %0 {offsets = [0, 2], sizes = [16, 1], strides = [1, 1]} : vector<16x3xf32> to vector<16x1xf32>
    %4 = arith.fptosi %3 : vector<16x1xf32> to vector<16x1xi32>
    %5 = tpu.iota {dimensions = array<i32: 1>} : vector<16x128xi32>
    %6 = vector.broadcast %4 : vector<16x1xi32> to vector<16x128xi32>
    %7 = arith.cmpi eq, %5, %6 : vector<16x128xi32>
    %c100_i32 = arith.constant 100 : i32
    %8 = vector.broadcast %c100_i32 : i32 to vector<16x128xi32>
    %9 = arith.cmpi eq, %5, %8 : vector<16x128xi32>
    %c101_i32 = arith.constant 101 : i32
    %10 = vector.broadcast %c101_i32 : i32 to vector<16x128xi32>
    %11 = arith.cmpi eq, %5, %10 : vector<16x128xi32>
    %cst = arith.constant 0.000000e+00 : f32
    %12 = vector.shape_cast %2 : vector<16x1xf32> to vector<16x1xf32>
    %13 = vector.broadcast %12 : vector<16x1xf32> to vector<16x128xf32>
    %14 = vector.broadcast %cst : f32 to vector<16x128xf32>
    %15 = arith.select %11, %13, %14 : vector<16x128xi1>, vector<16x128xf32>
    %16 = vector.shape_cast %1 : vector<16x1xf32> to vector<16x1xf32>
    %17 = vector.broadcast %16 : vector<16x1xf32> to vector<16x128xf32>
    %18 = arith.select %9, %17, %15 : vector<16x128xi1>, vector<16x128xf32>
    %cst_1 = arith.constant 1.000000e+00 : f32
    %19 = vector.broadcast %cst_1 : f32 to vector<16x128xf32>
    %20 = arith.select %7, %19, %18 : vector<16x128xi1>, vector<16x128xf32>
    %21 = arith.truncf %20 : vector<16x128xf32> to vector<16x128xbf16>
    %c0_2 = arith.constant 0 : index
    %c0_3 = arith.constant 0 : index
    %22 = vector.load %arg2[%c0_2, %c0_3] : memref<128x384xbf16, #tpu.memory_space<vmem>>, vector<128x384xbf16>
    %cst_4 = arith.constant dense<0.000000e+00> : vector<16x384xf32>
    %23 = tpu.matmul %21, %22, %cst_4 {dimension_numbers = #tpu.dot_dimension_numbers<[1], [0], [0], [1], [0, 0, 1, 1], [], []>} : vector<16x128xbf16>, vector<128x384xbf16>, vector<16x384xf32> -> vector<16x384xf32>
    %24 = vector.extract_strided_slice %23 {offsets = [0, 128], sizes = [16, 128], strides = [1, 1]} : vector<16x384xf32> to vector<16x128xf32>
    %25 = vector.extract_strided_slice %23 {offsets = [0, 256], sizes = [16, 128], strides = [1, 1]} : vector<16x384xf32> to vector<16x128xf32>
    %26 = vector.extract_strided_slice %23 {offsets = [0, 0], sizes = [16, 128], strides = [1, 1]} : vector<16x384xf32> to vector<16x128xf32>
    %c0_5 = arith.constant 0 : index
    %c0_6 = arith.constant 0 : index
    %27 = vector.load %arg3[%c0_5, %c0_6] : memref<1x128xf32, #tpu.memory_space<vmem>>, vector<1x128xf32>
    %28 = vector.broadcast %27 : vector<1x128xf32> to vector<16x128xf32>
    %29 = arith.addf %26, %28 : vector<16x128xf32>
    %cst_7 = arith.constant 0.000000e+00 : f32
    %30 = vector.broadcast %cst_7 : f32 to vector<16x128xf32>
    %31 = arith.maximumf %29, %30 : vector<16x128xf32>
    %32 = arith.truncf %31 : vector<16x128xf32> to vector<16x128xbf16>
    %c0_8 = arith.constant 0 : index
    %c0_9 = arith.constant 0 : index
    %33 = vector.load %arg4[%c0_8, %c0_9] : memref<128x128xbf16, #tpu.memory_space<vmem>>, vector<128x128xbf16>
    %cst_10 = arith.constant dense<0.000000e+00> : vector<16x128xf32>
    %34 = tpu.matmul %32, %33, %cst_10 {dimension_numbers = #tpu.dot_dimension_numbers<[1], [0], [0], [1], [0, 0, 1, 1], [], []>} : vector<16x128xbf16>, vector<128x128xbf16>, vector<16x128xf32> -> vector<16x128xf32>
    %c0_11 = arith.constant 0 : index
    %c0_12 = arith.constant 0 : index
    %35 = vector.load %arg5[%c0_11, %c0_12] : memref<1x128xf32, #tpu.memory_space<vmem>>, vector<1x128xf32>
    %36 = vector.broadcast %35 : vector<1x128xf32> to vector<16x128xf32>
    %37 = arith.addf %34, %36 : vector<16x128xf32>
    %38 = arith.addf %37, %24 : vector<16x128xf32>
    %cst_13 = arith.constant 0.000000e+00 : f32
    %39 = vector.broadcast %cst_13 : f32 to vector<16x128xf32>
    %40 = arith.maximumf %38, %39 : vector<16x128xf32>
    %41 = arith.truncf %40 : vector<16x128xf32> to vector<16x128xbf16>
    %c0_14 = arith.constant 0 : index
    %c0_15 = arith.constant 0 : index
    %42 = vector.load %arg6[%c0_14, %c0_15] : memref<128x128xbf16, #tpu.memory_space<vmem>>, vector<128x128xbf16>
    %cst_16 = arith.constant dense<0.000000e+00> : vector<16x128xf32>
    %43 = tpu.matmul %41, %42, %cst_16 {dimension_numbers = #tpu.dot_dimension_numbers<[1], [0], [0], [1], [0, 0, 1, 1], [], []>} : vector<16x128xbf16>, vector<128x128xbf16>, vector<16x128xf32> -> vector<16x128xf32>
    %c0_17 = arith.constant 0 : index
    %c0_18 = arith.constant 0 : index
    %44 = vector.load %arg7[%c0_17, %c0_18] : memref<1x128xf32, #tpu.memory_space<vmem>>, vector<1x128xf32>
    %45 = vector.broadcast %44 : vector<1x128xf32> to vector<16x128xf32>
    %46 = arith.addf %43, %45 : vector<16x128xf32>
    %47 = arith.addf %46, %25 : vector<16x128xf32>
    %cst_19 = arith.constant 0.000000e+00 : f32
    %48 = vector.broadcast %cst_19 : f32 to vector<16x128xf32>
    %49 = arith.maximumf %47, %48 : vector<16x128xf32>
    %50 = arith.truncf %49 : vector<16x128xf32> to vector<16x128xbf16>
    %c0_20 = arith.constant 0 : index
    %c0_21 = arith.constant 0 : index
    %51 = vector.load %arg8[%c0_20, %c0_21] : memref<128x128xbf16, #tpu.memory_space<vmem>>, vector<128x128xbf16>
    %cst_22 = arith.constant dense<0.000000e+00> : vector<16x128xf32>
    %52 = tpu.matmul %50, %51, %cst_22 {dimension_numbers = #tpu.dot_dimension_numbers<[1], [0], [0], [1], [0, 0, 1, 1], [], []>} : vector<16x128xbf16>, vector<128x128xbf16>, vector<16x128xf32> -> vector<16x128xf32>
    %53 = vector.extract_strided_slice %52 {offsets = [0, 0], sizes = [16, 2], strides = [1, 1]} : vector<16x128xf32> to vector<16x2xf32>
    %c0_23 = arith.constant 0 : index
    %c0_24 = arith.constant 0 : index
    %54 = vector.load %arg9[%c0_23, %c0_24] : memref<1x2xf32, #tpu.memory_space<vmem>>, vector<1x2xf32>
    %55 = vector.broadcast %54 : vector<1x2xf32> to vector<16x2xf32>
    %56 = arith.addf %53, %55 : vector<16x2xf32>
    %c0_25 = arith.constant 0 : index
    %c0_26 = arith.constant 0 : index
    %57 = vector.load %arg10[%c0_25, %c0_26] : memref<16x2xf32, #tpu.memory_space<vmem>>, vector<16x2xf32>
    tpu.vector_store %arg10[%c0_25, %c0_26], %56 {strides = array<i32>} : memref<16x2xf32, #tpu.memory_space<vmem>>, vector<16x2xf32>,
    return
  }
  func.func @transform_0(%arg0: i32) -> (i32, i32) {
    %c0_i32 = arith.constant 0 : i32
    %c0_i32_0 = arith.constant 0 : i32
    return %arg0, %c0_i32 : i32, i32
  }
  func.func @transform_1(%arg0: i32) -> (i32, i32) {
    %c0_i32 = arith.constant 0 : i32
    %c0_i32_0 = arith.constant 0 : i32
    %c0_i32_1 = arith.constant 0 : i32
    return %c0_i32, %c0_i32_0 : i32, i32
  }
  func.func @transform_2(%arg0: i32) -> (i32, i32) {
    %c0_i32 = arith.constant 0 : i32
    %c0_i32_0 = arith.constant 0 : i32
    %c0_i32_1 = arith.constant 0 : i32
    return %c0_i32, %c0_i32_0 : i32, i32
  }
  func.func @transform_3(%arg0: i32) -> (i32, i32) {
    %c0_i32 = arith.constant 0 : i32
    %c0_i32_0 = arith.constant 0 : i32
    %c0_i32_1 = arith.constant 0 : i32
    return %c0_i32, %c0_i32_0 : i32, i32
  }
  func.func @transform_4(%arg0: i32) -> (i32, i32) {
    %c0_i32 = arith.constant 0 : i32
    %c0_i32_0 = arith.constant 0 : i32
    %c0_i32_1 = arith.constant 0 : i32
    return %c0_i32, %c0_i32_0 : i32, i32
  }
  func.func @transform_5(%arg0: i32) -> (i32, i32) {
    %c0_i32 = arith.constant 0 : i32
    %c0_i32_0 = arith.constant 0 : i32
    %c0_i32_1 = arith.constant 0 : i32
    return %c0_i32, %c0_i32_0 : i32, i32
  }
  func.func @transform_6(%arg0: i32) -> (i32, i32) {
    %c0_i32 = arith.constant 0 : i32
    %c0_i32_0 = arith.constant 0 : i32
    %c0_i32_1 = arith.constant 0 : i32
    return %c0_i32, %c0_i32_0 : i32, i32
  }
  func.func @transform_7(%arg0: i32) -> (i32, i32) {
    %c0_i32 = arith.constant 0 : i32
    %c0_i32_0 = arith.constant 0 : i32
    %c0_i32_1 = arith.constant 0 : i32
    return %c0_i32, %c0_i32_0 : i32, i32
  }
  func.func @transform_8(%arg0: i32) -> (i32, i32) {
    %c0_i32 = arith.constant 0 : i32
    %c0_i32_0 = arith.constant 0 : i32
    %c0_i32_1 = arith.constant 0 : i32
    return %c0_i32, %c0_i32_0 : i32, i32
  }
  func.func @transform_9(%arg0: i32) -> (i32, i32) {
    %c0_i32 = arith.constant 0 : i32
    %c0_i32_0 = arith.constant 0 : i32
    return %arg0, %c0_i32 : i32, i32
  }
}

</mosaic_0001>

<bundles_post_ra>
// kernel: mlp_diffusion_forward.1
= control target key start
LH: loop header
LB: loop body
LE: loop exit
PB: predicated region body
PF: predicated region fallthrough
CT: control target
= control target key end

     0   :  { %14 = vsyncpa [#allocation3], 0  ;;  %s1236_s0 = inlined_call_operand.vmem [shape: f32[16,3], index: 0, kind: input, shape index: {}]   ;;  %s1237_s1 = inlined_call_operand.hbm [shape: bf16[128,384], index: 1, kind: input, shape index: {}]   ;;  %s1238_s2 = inlined_call_operand.vmem [shape: f32[1,128], index: 2, kind: input, shape index: {}]   ;;  %s1239_s3 = inlined_call_operand.hbm [shape: bf16[128,128], index: 3, kind: input, shape index: {}]   ;;  %s1240_s4 = inlined_call_operand.vmem [shape: f32[1,128], index: 4, kind: input, shape index: {}]   ;;  %s1241_s5 = inlined_call_operand.hbm [shape: bf16[128,128], index: 5, kind: input, shape index: {}]   ;;  %s1242_s6 = inlined_call_operand.vmem [shape: f32[1,128], index: 6, kind: input, shape index: {}]   ;;  %s1243_s7 = inlined_call_operand.hbm [shape: bf16[128,128], index: 7, kind: input, shape index: {}]   ;;  %s1244_s8 = inlined_call_operand.vmem [shape: f32[1,2], index: 8, kind: input, shape index: {}]   ;;  %s1245_s9 = inlined_call_operand.vmem [shape: f32[16,2], index: 9, kind: output, shape index: {}]  }
   0x1   :  { %15 = vsyncpa [#allocation5], 0 }
   0x2   :  { %16 = vsyncpa [#allocation8], 0  ;;  %s1085_s30 = smov [#allocation4]  }
   0x3   :  { %s38_s10 = sshll.u32 %s1085_s30, 4  ;;  %s39_s10 = int_to_ptr.vmem [resolvable:$true] %s38_s10 }
   0x4   :  { %s1007_s11 = scalar_lea.vmem %s39_s10, 1024  ;;  %p1012_p1 = scmp.lt.s32.totalorder %s39_s10, %s39_s10 }
   0x5   :  { %p1008_p0 = scmp.ne.s32.totalorder %s39_s10, %s1007_s11  ;;  %p1013_p2 = scmp.lt.s32.totalorder %s1007_s11, %s1007_s11 }
   0x7   :  { %p1014_p3 = por %p1013_p2, %p1012_p1 }
   0x9   :  { %p1015_p4 = pnand %p1014_p3, %p1008_p0 }
   0xb   :  { %1018 = shalt.err (!%p1015_p4)
}
   0xc   :  { %s1086_s12 = smov 64   ;;  %s1087_s13 = smov 4  }
   0xd   :  { %44 = dma.hbm_to_vmem [thread:$0]  %s1239_s3, 1024, %s39_s10, [#allocation5], %s1086_s12, %s1086_s12, %s1087_s13  }
   0xe   :  { %s1088_s16 = smov [#allocation2]  }
   0xf   :  { %s24_s17 = sshll.u32 %s1088_s16, 4  ;;  %s25_s17 = int_to_ptr.vmem [resolvable:$true] %s24_s17 }
  0x10   :  { %s1027_s18 = scalar_lea.vmem %s25_s17, 3072  ;;  %p1032_p6 = scmp.lt.s32.totalorder %s25_s17, %s25_s17 }
  0x11   :  { %p1028_p5 = scmp.ne.s32.totalorder %s25_s17, %s1027_s18  ;;  %p1033_p7 = scmp.lt.s32.totalorder %s1027_s18, %s1027_s18 }
  0x13   :  { %p1034_p8 = por %p1033_p7, %p1032_p6 }
  0x15   :  { %p1035_p9 = pnand %p1034_p8, %p1028_p5 }
  0x17   :  { %1038 = shalt.err (!%p1035_p9)
}
  0x18   :  { %s1089_s19 = smov 192   ;;  %s1090_s20 = smov 12  }
  0x19   :  { %30 = dma.hbm_to_vmem [thread:$0]  %s1237_s1, 3072, %s25_s17, [#allocation3], %s1089_s19, %s1089_s19, %s1090_s20  }
  0x1a   :  { %s1091_s23 = smov [#allocation6]   ;;  %s1092_s25 = smov [#allocation7]  }
  0x1b   :  { %s52_s24 = sshll.u32 %s1091_s23, 4  ;;  %s66_s3 = sshll.u32 %s1092_s25, 4  ;;  %s53_s24 = int_to_ptr.vmem [resolvable:$true] %s52_s24  ;;  %s67_s3 = int_to_ptr.vmem [resolvable:$true] %s66_s3 }
  0x1c   :  { %s1047_s26 = scalar_lea.vmem %s53_s24, 1024  ;;  %p1052_p11 = scmp.lt.s32.totalorder %s53_s24, %s53_s24 }
  0x1d   :  { %p1048_p10 = scmp.ne.s32.totalorder %s53_s24, %s1047_s26  ;;  %p1053_p12 = scmp.lt.s32.totalorder %s1047_s26, %s1047_s26 }
  0x1f   :  { %p1054_p13 = por %p1053_p12, %p1052_p11 }
  0x21   :  { %p1055_p0 = pnand %p1054_p13, %p1048_p10 }
  0x23   :  { %1058 = shalt.err (!%p1055_p0)
}
  0x24   :  { %58 = dma.hbm_to_vmem [thread:$0]  %s1241_s5, 1024, %s53_s24, [#allocation5], %s1086_s12, %s1086_s12, %s1087_s13  }
  0x25   :  { %s1067_s1 = scalar_lea.vmem %s67_s3, 1024  ;;  %p1072_p2 = scmp.lt.s32.totalorder %s67_s3, %s67_s3 }
  0x26   :  { %p1068_p1 = scmp.ne.s32.totalorder %s67_s3, %s1067_s1  ;;  %p1073_p3 = scmp.lt.s32.totalorder %s1067_s1, %s1067_s1 }
  0x28   :  { %p1074_p4 = por %p1073_p3, %p1072_p2 }
  0x2a   :  { %p1075_p5 = pnand %p1074_p4, %p1068_p1 }
  0x2c   :  { %1078 = shalt.err (!%p1075_p5)
}
  0x2d   :  { %72 = dma.hbm_to_vmem [thread:$0]  %s1243_s7, 1024, %s67_s3, [#allocation8], %s1086_s12, %s1086_s12, %s1087_s13  }
  0x2e   :  { %1079 = dma.done.wait [#allocation3], 3072  }
  0x2f   :  { %1080 = vsyncadd [#allocation3], 4294964224 }
  0x30   :  { %1081 = dma.done.wait [#allocation5], 2048  }
  0x31   :  { %1082 = vsyncadd [#allocation5], 4294965248 }
  0x32   :  { %1083 = dma.done.wait [#allocation8], 1024  }
  0x33   :  { %1084 = vsyncadd [#allocation8], 4294966272  ;;  %v1093_v0 = vmov 2   ;;  %v1094_v1 = vmov 1   ;;  %v1095_v2 = vmov 0.0   ;;  %v1096_v3 = vmov 0  }
  0x34   :  { %935 = vset.pattern.permute.xlu1 %v1093_v0  ;;  %928 = vset.pattern.permute.xlu0 %v1094_v1  ;;  %v89_v4 = vld [vmem:[%s1236_s0 + $0x8] sm:$0xff]  ;;  %v88_v5 = vld [vmem:[%s1236_s0] sm:$0xff]  ;;  %v946_v11 = vld [vmem:[#allocation2 + $0xb0] ss:$12 sps:$4 sm:$0xff]   ;;  %vm1097_vm0 = vmmov 0   ;;  %v92_v35 = vlaneseq  ;;  %vm733_vm5 = vcmask 15360  }
  0x35   :  { %831 = vmatprep.subr.bf16.mxu1 %v1095_v2  ;;  %321 = vmatprep.mubr.bf16.mxu0 %v1096_v3  ;;  %v913_v6 = vtrunc.f32 %v89_v4  ;;  %v929_v7 = vpack.i.bf16 %v89_v4, %v88_v5  ;;  %v911_v8 = vtrunc.f32 %v88_v5  ;;  %v943_v9 = vld [vmem:[#allocation2 + $0xac] ss:$12 sps:$4 sm:$0xff]   ;;  %v945_v10 = vld [vmem:[#allocation2 + $0xa8] ss:$12 sps:$4 sm:$0xff]   ;;  %v949_v15 = vld [vmem:[#allocation2 + $0x90] ss:$12 sps:$4 sm:$0xff]  }
  0x36   :  { %289 = vmatprep.subr.bf16.mxu0 %v943_v9  ;;  %v947_v13 = vld [vmem:[#allocation2 + $0x94] ss:$12 sps:$4 sm:$0xff]   ;;  %832 = vmatpush3.bf16.msra.mxu1 %v946_v11  ;;  %v950_v16 = vld [vmem:[#allocation2 + $0x98] ss:$12 sps:$4 sm:$0xff]   ;;  %v951_v17 = vld [vmem:[#allocation2 + $0x7c] ss:$12 sps:$4 sm:$0xff]  }
  0x37   :  { %v914_v12 = vcvt.f32.s32 %v913_v6  ;;  %930 = vperm.xlu0 %928, %v929_v7   ;;  %v912_v14 = vcvt.f32.s32 %v911_v8  ;;  %290 = vmatpush1.bf16.msra.mxu0 %v945_v10  ;;  %v953_v18 = vld [vmem:[#allocation2 + $0x78] ss:$12 sps:$4 sm:$0xff]   ;;  %v954_v19 = vld [vmem:[#allocation2 + $0x80] ss:$12 sps:$4 sm:$0xff]   ;;  %v958_v22 = vld [vmem:[#allocation2 + $0x68] ss:$12 sps:$4 sm:$0xff]  }
  0x38   :  { %291 = vmatprep.subr.bf16.mxu0 %v947_v13  ;;  %833 = vmatprep.subr.bf16.mxu1 %v1095_v2  ;;  %v955_v20 = vld [vmem:[#allocation2 + $0x64] ss:$12 sps:$4 sm:$0xff]   ;;  %v957_v21 = vld [vmem:[#allocation2 + $0x60] ss:$12 sps:$4 sm:$0xff]   ;;  %v961_v24 = vld [vmem:[#allocation2 + $0x48] ss:$12 sps:$4 sm:$0xff]  }
  0x39   :  { %98 = vperm.xlu1 %935, %v914_v12   ;;  %847 = vmatprep.mubr.msk.bf16.mxu1 %vm1097_vm0, %v1095_v2  ;;  %v959_v23 = vld [vmem:[#allocation2 + $0x4c] ss:$12 sps:$4 sm:$0xff]   ;;  %v962_v25 = vld [vmem:[#allocation2 + $0x50] ss:$12 sps:$4 sm:$0xff]   ;;  %v963_v26 = vld [vmem:[#allocation2 + $0x34] ss:$12 sps:$4 sm:$0xff]  }
  0x3a   :  { %834 = vmatpush3.bf16.msra.mxu1 %v950_v16  ;;  %v965_v27 = vld [vmem:[#allocation2 + $0x30] ss:$12 sps:$4 sm:$0xff]   ;;  %v966_v28 = vld [vmem:[#allocation2 + $0x38] ss:$12 sps:$4 sm:$0xff]   ;;  %v970_v31 = vld [vmem:[#allocation2 + $0x20] ss:$12 sps:$4 sm:$0xff]  }
  0x3b   :  { %934 = vset.pattern.permute.xlu0 %v1093_v0  ;;  %292 = vmatpush1.bf16.msra.mxu0 %v949_v15  ;;  %v967_v29 = vld [vmem:[#allocation2 + $0x1c] ss:$12 sps:$4 sm:$0xff]   ;;  %v969_v30 = vld [vmem:[#allocation2 + $0x18] ss:$12 sps:$4 sm:$0xff]   ;;  %v973_v33 = vld [vmem:[#allocation2] ss:$12 sps:$4 sm:$0xff]  }
  0x3c   :  { %95 = vperm.xlu0 %934, %v912_v14   ;;  %293 = vmatprep.subr.bf16.mxu0 %v951_v17  ;;  %v971_v32 = vld [vmem:[#allocation2 + $0x4] ss:$12 sps:$4 sm:$0xff]   ;;  %v974_v34 = vld [vmem:[#allocation2 + $0x8] ss:$12 sps:$4 sm:$0xff]   ;;  %v93_v38 = vand.u32 127, %v92_v35  ;;  %v975_v51 = vld [vmem:[#allocation4 + $0x38] sm:$0xff]  }
  0x3d   :  { %936 = vset.pattern.permute.xlu1 %v1096_v3  ;;  %835 = vmatprep.subr.bf16.mxu1 %v1095_v2  ;;  %v976_v53 = vld [vmem:[#allocation4 + $0x30] sm:$0xff]   ;;  %v977_v54 = vld [vmem:[#allocation4 + $0x28] sm:$0xff]   ;;  %v978_v55 = vld [vmem:[#allocation4 + $0x20] sm:$0xff]  }
  0x3e   :  { %938 = vperm.xlu1 %936, %v929_v7   ;;  %836 = vmatpush3.bf16.msra.mxu1 %v954_v19  ;;  %vm103_vm1 = vcmp.eq.s32.totalorder %v93_v38, 101  ;;  %vm102_vm2 = vcmp.eq.s32.totalorder %v93_v38, 100  ;;  %v979_v56 = vld [vmem:[#allocation4 + $0x18] sm:$0xff]   ;;  %v980_v57 = vld [vmem:[#allocation4 + $0x10] sm:$0xff]   ;;  %v981_v58 = vld [vmem:[#allocation4 + $0x8] sm:$0xff]  }
  0x3f   :  { %294 = vmatpush1.bf16.msra.mxu0 %v953_v18  ;;  %837 = vmatprep.subr.bf16.mxu1 %v1095_v2  ;;  %v982_v59 = vld [vmem:[#allocation4] sm:$0xff]   ;;  %v983_v60 = vld [vmem:[#allocation6 + $0x38] sm:$0xff]   ;;  %v984_v61 = vld [vmem:[#allocation6 + $0x30] sm:$0xff]  }
  0x40   :  { %942 = vset.pattern.permute.xlu0 %v1096_v3  ;;  %295 = vmatprep.subr.bf16.mxu0 %v955_v20  ;;  %v985_v62 = vld [vmem:[#allocation6 + $0x28] sm:$0xff]   ;;  %v986_v63 = vld [vmem:[#allocation6 + $0x20] sm:$0xff]   ;;  %v987_v0 = vld [vmem:[#allocation6 + $0x18] sm:$0xff]  }
  0x41   :  { %v767_v3 = vld [vmem:[%s1238_s2] ss:$0 sm:$0xff]  ;;  %v988_v15 = vld [vmem:[#allocation6 + $0x10] sm:$0xff]   ;;  %v989_v16 = vld [vmem:[#allocation6 + $0x8] sm:$0xff]  }
  0x42   :  { %838 = vmatpush3.bf16.msra.mxu1 %v958_v22  ;;  %v990_v17 = vld [vmem:[#allocation6] sm:$0xff]   ;;  %v991_v18 = vld [vmem:[#allocation7 + $0x38] sm:$0xff]   ;;  %v992_v19 = vld [vmem:[#allocation7 + $0x30] sm:$0xff]  }
  0x43   :  { %296 = vmatpush1.bf16.msra.mxu0 %v957_v21  ;;  %839 = vmatprep.subr.bf16.mxu1 %v1095_v2  ;;  %v993_v20 = vld [vmem:[#allocation7 + $0x28] sm:$0xff]   ;;  %v994_v21 = vld [vmem:[#allocation7 + $0x20] sm:$0xff]   ;;  %v995_v22 = vld [vmem:[#allocation7 + $0x18] sm:$0xff]  }
  0x44   :  { %297 = vmatprep.subr.bf16.mxu0 %v959_v23 }
  0x46   :  { %840 = vmatpush3.bf16.msra.mxu1 %v962_v25 }
  0x47   :  { %298 = vmatpush1.bf16.msra.mxu0 %v961_v24  ;;  %841 = vmatprep.subr.bf16.mxu1 %v1095_v2  ;;  %v768_v24 = vld [vmem:[%s1240_s4] ss:$0 sm:$0xff] }
  0x48   :  { %299 = vmatprep.subr.bf16.mxu0 %v963_v26 }
  0x4a   :  { %842 = vmatpush3.bf16.msra.mxu1 %v966_v28 }
  0x4b   :  { %300 = vmatpush1.bf16.msra.mxu0 %v965_v27  ;;  %843 = vmatprep.subr.bf16.mxu1 %v1095_v2 }
  0x4c   :  { %301 = vmatprep.subr.bf16.mxu0 %v967_v29 }
  0x4e   :  { %844 = vmatpush3.bf16.msra.mxu1 %v970_v31 }
  0x4f   :  { %302 = vmatpush1.bf16.msra.mxu0 %v969_v30  ;;  %845 = vmatprep.subr.bf16.mxu1 %v1095_v2 }
  0x50   :  { %303 = vmatprep.subr.bf16.mxu0 %v971_v32 }
  0x52   :  { %846 = vmatpush3.bf16.msra.mxu1 %v974_v34 }
  0x53   :  { %304 = vmatpush1.bf16.msra.mxu0 %v973_v33  ;;  %871 = vmatprep.subr.bf16.mxu1 %v1095_v2 }
  0x54   :  { %851 = vmatprep.subr.bf16.mxu0 %v1095_v2 }
  0xb2   :  { %v931_v36 = vpop.permute.xlu0 %930 }
  0xb3   :  { %v933_v39 = vunpack.i.h.bf16 %v931_v36  ;;  %v932_v40 = vunpack.i.l.bf16 %v931_v36  ;;  %v996_v36 = vld [vmem:[#allocation7 + $0x10] sm:$0xff]  }
  0xb4   :  { %v99_v37 = vpop.permute.xlu1 %98 }
  0xb5   :  { %v115_v45 = vsel %vm103_vm1, %v933_v39, 0.0  ;;  %v114_v46 = vsel %vm103_vm1, %v932_v40, 0.0  ;;  %vm101_vm4 = vcmp.eq.s32.totalorder %v93_v38, %v99_v37  ;;  %v997_v37 = vld [vmem:[#allocation7 + $0x8] sm:$0xff]   ;;  %v777_v39 = vld [vmem:[%s1242_s6] ss:$0 sm:$0xff] }
  0xb7   :  { %v96_v41 = vpop.permute.xlu0 %95 }
  0xb8   :  { %vm100_vm3 = vcmp.eq.s32.totalorder %v93_v38, %v96_v41  ;;  %v998_v38 = vld [vmem:[#allocation7] sm:$0xff]  }
  0xb9   :  { %v939_v42 = vpop.permute.xlu1 %938 }
  0xba   :  { %v941_v43 = vunpack.i.h.bf16 %v939_v42  ;;  %v940_v44 = vunpack.i.l.bf16 %v939_v42 }
  0xbc   :  { %v124_v47 = vsel %vm102_vm2, %v940_v44, %v114_v46  ;;  %v125_v48 = vsel %vm102_vm2, %v941_v43, %v115_v45 }
  0xbd   :  { %v127_v49 = vsel %vm101_vm4, 1.0, %v125_v48  ;;  %v126_v50 = vsel %vm100_vm3, 1.0, %v124_v47 }
  0xbe   :  { %v128_v52 = vpack.c.bf16 %v127_v49, %v126_v50 }
  0xc0   :  { %322 = vmatmul.mubr.bf16.vlgmr.msra.gmra.mxu0 %v128_v52  ;;  %848 = vmatmul.mubr.bf16.vlgmr.msra.gmra.mxu1 %v128_v52 }
  0xc1   :  { %852 = vmatpush3.bf16.msra.mxu0 %v975_v51  ;;  %867 = vmatprep.mubr.msk.bf16.mxu0 %vm1097_vm0, %v1095_v2 }
  0xc2   :  { %853 = vmatprep.subr.bf16.mxu0 %v1095_v2  ;;  %887 = vmatprep.mubr.msk.bf16.mxu1 %vm1097_vm0, %v1095_v2 }
  0xc3   :  { %872 = vmatpush3.bf16.msra.mxu1 %v983_v60 }
  0xc4   :  { %873 = vmatprep.subr.bf16.mxu1 %v1095_v2 }
  0xc5   :  { %854 = vmatpush3.bf16.msra.mxu0 %v976_v53 }
  0xc6   :  { %855 = vmatprep.subr.bf16.mxu0 %v1095_v2 }
  0xc7   :  { %874 = vmatpush3.bf16.msra.mxu1 %v984_v61 }
  0xc8   :  { %875 = vmatprep.subr.bf16.mxu1 %v1095_v2 }
  0xc9   :  { %856 = vmatpush3.bf16.msra.mxu0 %v977_v54 }
  0xca   :  { %857 = vmatprep.subr.bf16.mxu0 %v1095_v2 }
  0xcb   :  { %876 = vmatpush3.bf16.msra.mxu1 %v985_v62 }
  0xcc   :  { %877 = vmatprep.subr.bf16.mxu1 %v1095_v2 }
  0xcd   :  { %858 = vmatpush3.bf16.msra.mxu0 %v978_v55 }
  0xce   :  { %859 = vmatprep.subr.bf16.mxu0 %v1095_v2 }
  0xcf   :  { %878 = vmatpush3.bf16.msra.mxu1 %v986_v63 }
  0xd0   :  { %879 = vmatprep.subr.bf16.mxu1 %v1095_v2 }
  0xd1   :  { %860 = vmatpush3.bf16.msra.mxu0 %v979_v56 }
  0xd2   :  { %861 = vmatprep.subr.bf16.mxu0 %v1095_v2 }
  0xd3   :  { %880 = vmatpush3.bf16.msra.mxu1 %v987_v0 }
  0xd4   :  { %881 = vmatprep.subr.bf16.mxu1 %v1095_v2 }
  0xd5   :  { %862 = vmatpush3.bf16.msra.mxu0 %v980_v57 }
  0xd6   :  { %863 = vmatprep.subr.bf16.mxu0 %v1095_v2 }
  0xd7   :  { %882 = vmatpush3.bf16.msra.mxu1 %v988_v15 }
  0xd8   :  { %883 = vmatprep.subr.bf16.mxu1 %v1095_v2 }
  0xd9   :  { %864 = vmatpush3.bf16.msra.mxu0 %v981_v58 }
  0xda   :  { %865 = vmatprep.subr.bf16.mxu0 %v1095_v2 }
  0xdb   :  { %884 = vmatpush3.bf16.msra.mxu1 %v989_v16 }
  0xdc   :  { %885 = vmatprep.subr.bf16.mxu1 %v1095_v2 }
  0xdd   :  { %866 = vmatpush3.bf16.msra.mxu0 %v982_v59 }
  0xde   :  { %891 = vmatprep.subr.bf16.mxu0 %v1095_v2 }
  0xdf   :  { %886 = vmatpush3.bf16.msra.mxu1 %v990_v17 }
 0x180   :  { %v323_v1 = vpop.f32.mrf.mxu0  ;;  %v1207_v4 = vpop.f32.mrf.mxu1 }
 0x181   :  { %v380_v7 = vadd.f32 %v767_v3, %v323_v1 }
 0x182   :  { %v325_v5 = vpop.f32.mrf.mxu0  ;;  %v849_v6 = vpop.f32.mrf.mxu1 }
 0x183   :  { %v382_v12 = vmax.f32 %v380_v7, 0.0 }
 0x184   :  { %v327_v8 = vpop.f32.mrf.mxu0  ;;  %v369_v9 = vpop.f32.mrf.mxu1 }
 0x185   :  { %v381_v10 = vadd.f32 %v767_v3, %v327_v8 }
 0x186   :  { %v850_v11 = vpop.f32.mrf.mxu1  ;;  %v329_v23 = vpop.f32.mrf.mxu0 }
 0x187   :  { %v383_v13 = vmax.f32 %v381_v10, 0.0 }
 0x189   :  { %v384_v14 = vpack.c.bf16 %v383_v13, %v382_v12 }
 0x18b   :  { %868 = vmatmul.mubr.bf16.vlgmr.msra.gmra.mxu0 %v384_v14 }
 0x18c   :  { %907 = vmatprep.mubr.msk.bf16.mxu0 %vm1097_vm0, %v1095_v2  ;;  %892 = vmatpush3.bf16.msra.mxu0 %v991_v18 }
 0x18d   :  { %893 = vmatprep.subr.bf16.mxu0 %v1095_v2 }
 0x190   :  { %894 = vmatpush3.bf16.msra.mxu0 %v992_v19 }
 0x191   :  { %895 = vmatprep.subr.bf16.mxu0 %v1095_v2 }
 0x194   :  { %896 = vmatpush3.bf16.msra.mxu0 %v993_v20 }
 0x195   :  { %897 = vmatprep.subr.bf16.mxu0 %v1095_v2 }
 0x198   :  { %898 = vmatpush3.bf16.msra.mxu0 %v994_v21 }
 0x199   :  { %899 = vmatprep.subr.bf16.mxu0 %v1095_v2 }
 0x19c   :  { %900 = vmatpush3.bf16.msra.mxu0 %v995_v22 }
 0x19d   :  { %901 = vmatprep.subr.bf16.mxu0 %v1095_v2 }
 0x1a0   :  { %902 = vmatpush3.bf16.msra.mxu0 %v996_v36 }
 0x1a1   :  { %903 = vmatprep.subr.bf16.mxu0 %v1095_v2 }
 0x1a4   :  { %904 = vmatpush3.bf16.msra.mxu0 %v997_v37 }
 0x1a5   :  { %905 = vmatprep.subr.bf16.mxu0 %v1095_v2  ;;  %v794_v2 = vld [vmem:[%s1244_s8] ss:$0 sm:$0xff] }
 0x1a8   :  { %906 = vmatpush3.bf16.msra.mxu0 %v998_v38 }
 0x24b   :  { %v490_v25 = vpop.f32.mrf.mxu0 }
 0x24c   :  { %v491_v26 = vadd.f32 %v768_v24, %v490_v25 }
 0x24d   :  { %v869_v27 = vpop.f32.mrf.mxu0 }
 0x24e   :  { %v497_v29 = vadd.f32 %v491_v26, %v325_v5 }
 0x24f   :  { %v493_v28 = vpop.f32.mrf.mxu0 }
 0x250   :  { %v494_v30 = vadd.f32 %v768_v24, %v493_v28  ;;  %v499_v33 = vmax.f32 %v497_v29, 0.0 }
 0x251   :  { %v870_v31 = vpop.f32.mrf.mxu0 }
 0x252   :  { %v498_v32 = vadd.f32 %v494_v30, %v329_v23 }
 0x254   :  { %v500_v34 = vmax.f32 %v498_v32, 0.0 }
 0x256   :  { %v501_v35 = vpack.c.bf16 %v500_v34, %v499_v33 }
 0x258   :  { %888 = vmatmul.mubr.bf16.vlgmr.msra.gmra.mxu1 %v501_v35 }
 0x318   :  { %v607_v40 = vpop.f32.mrf.mxu1 }
 0x319   :  { %v608_v41 = vadd.f32 %v777_v39, %v607_v40 }
 0x31a   :  { %v889_v42 = vpop.f32.mrf.mxu1 }
 0x31b   :  { %v614_v44 = vadd.f32 %v608_v41, %v1207_v4 }
 0x31c   :  { %v610_v43 = vpop.f32.mrf.mxu1 }
 0x31d   :  { %v611_v45 = vadd.f32 %v777_v39, %v610_v43  ;;  %v616_v48 = vmax.f32 %v614_v44, 0.0 }
 0x31e   :  { %v890_v46 = vpop.f32.mrf.mxu1 }
 0x31f   :  { %v615_v47 = vadd.f32 %v611_v45, %v369_v9 }
 0x321   :  { %v617_v49 = vmax.f32 %v615_v47, 0.0 }
 0x323   :  { %v618_v50 = vpack.c.bf16 %v617_v49, %v616_v48 }
 0x325   :  { %908 = vmatmul.mubr.bf16.vlgmr.msra.gmra.mxu0 %v618_v50 }
 0x3e5   :  { %v717_v51 = vpop.f32.mrf.mxu0 }
 0x3e6   :  { %v731_v52 = vadd.f32 %v794_v2, %v717_v51 }
 0x3e7   :  { %v909_v53 = vpop.f32.mrf.mxu0 }
 0x3e8   :  { %734 = vst.msk [vmem:[%s1245_s9] sm:$0xff] %vm733_vm5, %v731_v52 }
 0x3e9   :  { %v720_v54 = vpop.f32.mrf.mxu0 }
 0x3ea   :  { %v732_v55 = vadd.f32 %v794_v2, %v720_v54 }
 0x3eb   :  { %v910_v56 = vpop.f32.mrf.mxu0 }
 0x3ec   :  { %735 = vst.msk [vmem:[%s1245_s9 + $0x8] sm:$0xff] %vm733_vm5, %v732_v55 }
 0x3ed   :  { %740 = vsyncpa [#allocation3], 1 }
 0x3ee   :  { %741 = vsyncpa [#allocation5], 1 }
 0x3ef   :  { %742 = vsyncpa [#allocation8], 1 }

</bundles_post_ra>
